<compile_context>
chip_gen: v6e
topology: v6e:2x2x1
jax: 0.10.0
libtpu: 0.0.40
codegen_flags: <defaults>
</compile_context>

<pallas_src>
import functools

import jax
import jax.numpy as jnp
from jax.experimental import pallas as pl
from jax.experimental.pallas import tpu as pltpu


def _round_up(x, m):
    return ((x + m - 1) // m) * m


def _actor_kernel(s_ref, w1_ref, b1_ref, w2_ref, b2_ref, w3_ref, b3_ref, o_ref):
    # fc1 + relu  (bf16 operands on the MXU, f32 accumulation)
    h1 = jnp.dot(s_ref[...], w1_ref[...], preferred_element_type=jnp.float32)
    h1 = jnp.maximum(h1 + b1_ref[...], 0.0)

    # fc2 + relu
    h2 = jnp.dot(h1.astype(w2_ref.dtype), w2_ref[...],
                 preferred_element_type=jnp.float32)
    h2 = jnp.maximum(h2 + b2_ref[...], 0.0)

    # fc3 + tanh  (tanh lands on the EUP; output lanes are padded & dense)
    out = jnp.dot(h2.astype(w3_ref.dtype), w3_ref[...],
                  preferred_element_type=jnp.float32) + b3_ref[...]
    o_ref[...] = jnp.tanh(out).astype(o_ref.dtype)


@functools.partial(jax.jit, static_argnames=("block_b",))
def actor_forward(state, params, *, block_b=128):
    """state: [B, S] -> action: [B, A] = tanh(mlp(state))."""
    B, S = state.shape
    w1, b1, w2, b2, w3, b3 = (params["w1"], params["b1"], params["w2"],
                              params["b2"], params["w3"], params["b3"])
    H = w1.shape[0]
    A = w3.shape[0]

    # ---- wrapper-side layout plumbing (glue, not compute) ----
    # Batch tiling: whole batch in one step when small, else block_b-row tiles.
    bb = min(block_b, _round_up(B, 8))
    B_pad = _round_up(B, bb)
    # Lane-dense output: pad the action dim up to a multiple of 128 lanes.
    A_pad = _round_up(A, 128)

    cdt = jnp.bfloat16  # MXU operand dtype (accumulation stays f32 in-kernel)

    s_p = state
    if B_pad != B:
        s_p = jnp.pad(s_p, ((0, B_pad - B), (0, 0)))
    s_p = s_p.astype(cdt)

    w1_t = w1.T.astype(cdt)                                       # [S, H]
    w2_t = w2.T.astype(cdt)                                       # [H, H]
    w3_t = jnp.pad(w3.T, ((0, 0), (0, A_pad - A))).astype(cdt)    # [H, A_pad]
    b1r = b1.reshape(1, H).astype(jnp.float32)
    b2r = b2.reshape(1, H).astype(jnp.float32)
    b3r = jnp.pad(b3, (0, A_pad - A)).reshape(1, A_pad).astype(jnp.float32)

    grid = (B_pad // bb,)

    out = pl.pallas_call(
        _actor_kernel,
        out_shape=jax.ShapeDtypeStruct((B_pad, A_pad), jnp.float32),
        grid_spec=pltpu.PrefetchScalarGridSpec(
            num_scalar_prefetch=0,
            grid=grid,
            in_specs=[
                pl.BlockSpec((bb, S), lambda i: (i, 0)),        # state tile
                pl.BlockSpec((S, H), lambda i: (0, 0)),         # W1^T (resident)
                pl.BlockSpec((1, H), lambda i: (0, 0)),         # b1
                pl.BlockSpec((H, H), lambda i: (0, 0)),         # W2^T (resident)
                pl.BlockSpec((1, H), lambda i: (0, 0)),         # b2
                pl.BlockSpec((H, A_pad), lambda i: (0, 0)),     # W3^T (lane-padded)
                pl.BlockSpec((1, A_pad), lambda i: (0, 0)),     # b3 (lane-padded)
            ],
            out_specs=pl.BlockSpec((bb, A_pad), lambda i: (i, 0)),
        ),
        compiler_params=pltpu.CompilerParams(
            dimension_semantics=("parallel",)),
    )(s_p, w1_t, b1r, w2_t, b2r, w3_t, b3r)

    # Slice off batch / lane padding.
    return out[:B, :A]


def init_actor_params(key, state_size, action_size, hidden_size=128):
    """Deterministic init mimicking PyTorch nn.Linear default (U[-1/sqrt(fan_in), +])."""
    def linear(k, fan_in, fan_out):
        kw, kb = jax.random.split(k)
        bound = 1.0 / jnp.sqrt(fan_in)
        w = jax.random.uniform(kw, (fan_out, fan_in), jnp.float32, -bound, bound)
        b = jax.random.uniform(kb, (fan_out,), jnp.float32, -bound, bound)
        return w, b

    k1, k2, k3 = jax.random.split(key, 3)
    w1, b1 = linear(k1, state_size, hidden_size)
    w2, b2 = linear(k2, hidden_size, hidden_size)
    w3, b3 = linear(k3, hidden_size, action_size)
    return {"w1": w1, "b1": b1, "w2": w2, "b2": b2, "w3": w3, "b3": b3}


def actor_ref(state, p):
    h1 = jax.nn.relu(state @ p["w1"].T + p["b1"])
    h2 = jax.nn.relu(h1 @ p["w2"].T + p["b2"])
    return jnp.tanh(h2 @ p["w3"].T + p["b3"])


if __name__ == "__main__":
    key = jax.random.PRNGKey(0)
    k_s, k_p = jax.random.split(key)

    batch, state_size, action_size, hidden_size = 16, 16, 8, 32
    state = jax.random.normal(k_s, (batch, state_size), jnp.float32)
    params = init_actor_params(k_p, state_size, action_size, hidden_size)

    act = actor_forward(state, params, block_b=128)
    act = jax.block_until_ready(act)

    act_ref = actor_ref(state, params)
    assert act.shape == (batch, action_size)
    # bf16 MXU operands -> tolerance loosened vs pure-f32 (expected, per review).
    assert jnp.allclose(act, act_ref, atol=3e-2, rtol=3e-2), "mismatch vs JAX reference"

    print("KERNEL_OK")
</pallas_src>

<mosaic_0001>
module attributes {stable_mosaic.version = 11 : i64} {
  func.func @_actor_kernel(%arg0: i32, %arg1: memref<16x16xbf16, #tpu.memory_space<vmem>>, %arg2: memref<16x32xbf16, #tpu.memory_space<vmem>>, %arg3: memref<1x32xf32, #tpu.memory_space<vmem>>, %arg4: memref<32x32xbf16, #tpu.memory_space<vmem>>, %arg5: memref<1x32xf32, #tpu.memory_space<vmem>>, %arg6: memref<32x128xbf16, #tpu.memory_space<vmem>>, %arg7: memref<1x128xf32, #tpu.memory_space<vmem>>, %arg8: memref<16x128xf32, #tpu.memory_space<vmem>>) attributes {dimension_semantics = [#tpu.dimension_semantics<parallel>], iteration_bounds = array<i64: 1>, scalar_prefetch = 0 : i64, scratch_operands = 0 : i64, tpu.core_type = #tpu.core_type<tc>, window_params = [{transform_indices = @transform_0, window_bounds = array<i64: 16, 16>}, {pipeline_mode = #tpu.pipeline_mode<synchronous>, transform_indices = @transform_1, window_bounds = array<i64: 16, 32>}, {pipeline_mode = #tpu.pipeline_mode<synchronous>, transform_indices = @transform_2, window_bounds = array<i64: 1, 32>}, {pipeline_mode = #tpu.pipeline_mode<synchronous>, transform_indices = @transform_3, window_bounds = array<i64: 32, 32>}, {pipeline_mode = #tpu.pipeline_mode<synchronous>, transform_indices = @transform_4, window_bounds = array<i64: 1, 32>}, {pipeline_mode = #tpu.pipeline_mode<synchronous>, transform_indices = @transform_5, window_bounds = array<i64: 32, 128>}, {pipeline_mode = #tpu.pipeline_mode<synchronous>, transform_indices = @transform_6, window_bounds = array<i64: 1, 128>}, {transform_indices = @transform_7, window_bounds = array<i64: 16, 128>}]} {
    %c0 = arith.constant 0 : index
    %c0_0 = arith.constant 0 : index
    %0 = vector.load %arg1[%c0, %c0_0] : memref<16x16xbf16, #tpu.memory_space<vmem>>, vector<16x16xbf16>
    %c0_1 = arith.constant 0 : index
    %c0_2 = arith.constant 0 : index
    %1 = vector.load %arg2[%c0_1, %c0_2] : memref<16x32xbf16, #tpu.memory_space<vmem>>, vector<16x32xbf16>
    %cst = arith.constant dense<0.000000e+00> : vector<16x32xf32>
    %2 = tpu.matmul %0, %1, %cst {dimension_numbers = #tpu.dot_dimension_numbers<[1], [0], [0], [1], [0, 0, 1, 1], [], []>} : vector<16x16xbf16>, vector<16x32xbf16>, vector<16x32xf32> -> vector<16x32xf32>
    %c0_3 = arith.constant 0 : index
    %c0_4 = arith.constant 0 : index
    %3 = vector.load %arg3[%c0_3, %c0_4] : memref<1x32xf32, #tpu.memory_space<vmem>>, vector<1x32xf32>
    %4 = vector.broadcast %3 : vector<1x32xf32> to vector<16x32xf32>
    %5 = arith.addf %2, %4 : vector<16x32xf32>
    %cst_5 = arith.constant 0.000000e+00 : f32
    %6 = vector.broadcast %cst_5 : f32 to vector<16x32xf32>
    %7 = arith.maximumf %5, %6 : vector<16x32xf32>
    %8 = arith.truncf %7 : vector<16x32xf32> to vector<16x32xbf16>
    %c0_6 = arith.constant 0 : index
    %c0_7 = arith.constant 0 : index
    %9 = vector.load %arg4[%c0_6, %c0_7] : memref<32x32xbf16, #tpu.memory_space<vmem>>, vector<32x32xbf16>
    %cst_8 = arith.constant dense<0.000000e+00> : vector<16x32xf32>
    %10 = tpu.matmul %8, %9, %cst_8 {dimension_numbers = #tpu.dot_dimension_numbers<[1], [0], [0], [1], [0, 0, 1, 1], [], []>} : vector<16x32xbf16>, vector<32x32xbf16>, vector<16x32xf32> -> vector<16x32xf32>
    %c0_9 = arith.constant 0 : index
    %c0_10 = arith.constant 0 : index
    %11 = vector.load %arg5[%c0_9, %c0_10] : memref<1x32xf32, #tpu.memory_space<vmem>>, vector<1x32xf32>
    %12 = vector.broadcast %11 : vector<1x32xf32> to vector<16x32xf32>
    %13 = arith.addf %10, %12 : vector<16x32xf32>
    %cst_11 = arith.constant 0.000000e+00 : f32
    %14 = vector.broadcast %cst_11 : f32 to vector<16x32xf32>
    %15 = arith.maximumf %13, %14 : vector<16x32xf32>
    %16 = arith.truncf %15 : vector<16x32xf32> to vector<16x32xbf16>
    %c0_12 = arith.constant 0 : index
    %c0_13 = arith.constant 0 : index
    %17 = vector.load %arg6[%c0_12, %c0_13] : memref<32x128xbf16, #tpu.memory_space<vmem>>, vector<32x128xbf16>
    %cst_14 = arith.constant dense<0.000000e+00> : vector<16x128xf32>
    %18 = tpu.matmul %16, %17, %cst_14 {dimension_numbers = #tpu.dot_dimension_numbers<[1], [0], [0], [1], [0, 0, 1, 1], [], []>} : vector<16x32xbf16>, vector<32x128xbf16>, vector<16x128xf32> -> vector<16x128xf32>
    %c0_15 = arith.constant 0 : index
    %c0_16 = arith.constant 0 : index
    %19 = vector.load %arg7[%c0_15, %c0_16] : memref<1x128xf32, #tpu.memory_space<vmem>>, vector<1x128xf32>
    %20 = vector.broadcast %19 : vector<1x128xf32> to vector<16x128xf32>
    %21 = arith.addf %18, %20 : vector<16x128xf32>
    %22 = math.tanh %21 : vector<16x128xf32>
    %c0_17 = arith.constant 0 : index
    %c0_18 = arith.constant 0 : index
    %23 = vector.load %arg8[%c0_17, %c0_18] : memref<16x128xf32, #tpu.memory_space<vmem>>, vector<16x128xf32>
    tpu.vector_store %arg8[%c0_17, %c0_18], %22 {strides = array<i32>} : memref<16x128xf32, #tpu.memory_space<vmem>>, vector<16x128xf32>,
    return
  }
  func.func @transform_0(%arg0: i32) -> (i32, i32) {
    %c0_i32 = arith.constant 0 : i32
    %c0_i32_0 = arith.constant 0 : i32
    return %arg0, %c0_i32 : i32, i32
  }
  func.func @transform_1(%arg0: i32) -> (i32, i32) {
    %c0_i32 = arith.constant 0 : i32
    %c0_i32_0 = arith.constant 0 : i32
    %c0_i32_1 = arith.constant 0 : i32
    return %c0_i32, %c0_i32_0 : i32, i32
  }
  func.func @transform_2(%arg0: i32) -> (i32, i32) {
    %c0_i32 = arith.constant 0 : i32
    %c0_i32_0 = arith.constant 0 : i32
    %c0_i32_1 = arith.constant 0 : i32
    return %c0_i32, %c0_i32_0 : i32, i32
  }
  func.func @transform_3(%arg0: i32) -> (i32, i32) {
    %c0_i32 = arith.constant 0 : i32
    %c0_i32_0 = arith.constant 0 : i32
    %c0_i32_1 = arith.constant 0 : i32
    return %c0_i32, %c0_i32_0 : i32, i32
  }
  func.func @transform_4(%arg0: i32) -> (i32, i32) {
    %c0_i32 = arith.constant 0 : i32
    %c0_i32_0 = arith.constant 0 : i32
    %c0_i32_1 = arith.constant 0 : i32
    return %c0_i32, %c0_i32_0 : i32, i32
  }
  func.func @transform_5(%arg0: i32) -> (i32, i32) {
    %c0_i32 = arith.constant 0 : i32
    %c0_i32_0 = arith.constant 0 : i32
    %c0_i32_1 = arith.constant 0 : i32
    return %c0_i32, %c0_i32_0 : i32, i32
  }
  func.func @transform_6(%arg0: i32) -> (i32, i32) {
    %c0_i32 = arith.constant 0 : i32
    %c0_i32_0 = arith.constant 0 : i32
    %c0_i32_1 = arith.constant 0 : i32
    return %c0_i32, %c0_i32_0 : i32, i32
  }
  func.func @transform_7(%arg0: i32) -> (i32, i32) {
    %c0_i32 = arith.constant 0 : i32
    %c0_i32_0 = arith.constant 0 : i32
    return %arg0, %c0_i32 : i32, i32
  }
}

</mosaic_0001>

<bundles_post_ra>
// kernel: actor_forward.1
= control target key start
LH: loop header
LB: loop body
LE: loop exit
PB: predicated region body
PF: predicated region fallthrough
CT: control target
= control target key end

     0   :  { %v297_v0 = vmov 0.0   ;;  %vm298_vm0 = vmmov 0   ;;  %vm49_vm1 = vcmask 130048   ;;  %vm120_vm2 = vcmask 261120   ;;  %s374_s1 = inlined_call_operand.vmem [shape: bf16[16,32], index: 1, kind: input, shape index: {}]   ;;  %s375_s0 = inlined_call_operand.vmem [shape: bf16[16,16], index: 0, kind: input, shape index: {}]   ;;  %s376_s3 = inlined_call_operand.vmem [shape: bf16[32,32], index: 3, kind: input, shape index: {}]   ;;  %s377_s2 = inlined_call_operand.vmem [shape: f32[1,32], index: 2, kind: input, shape index: {}]   ;;  %s378_s5 = inlined_call_operand.vmem [shape: bf16[32,128], index: 5, kind: input, shape index: {}]   ;;  %s379_s4 = inlined_call_operand.vmem [shape: f32[1,32], index: 4, kind: input, shape index: {}]   ;;  %s380_s6 = inlined_call_operand.vmem [shape: f32[1,128], index: 6, kind: input, shape index: {}]   ;;  %s381_s7 = inlined_call_operand.vmem [shape: f32[16,128], index: 7, kind: output, shape index: {}]  }
   0x1   :  { %263 = vmatprep.subr.bf16.mxu0 %v297_v0  ;;  %v287_v1 = vld [vmem:[%s374_s1] sm:$0xff]   ;;  %265 = vmatprep.mubr.msk.bf16.mxu0 %vm298_vm0, %v297_v0  ;;  %v289_v3 = vld [vmem:[%s376_s3 + $0x8] sm:$0xff]  }
   0x2   :  { %v288_v2 = vld [vmem:[%s375_s0] sm:$0xff]   ;;  %269 = vmatprep.subr.bf16.mxu1 %v297_v0  ;;  %273 = vmatprep.mubr.msk.bf16.mxu1 %vm298_vm0, %v297_v0  ;;  %v291_v15 = vld [vmem:[%s378_s5 + $0x8] sm:$0xff]  }
   0x3   :  { %264 = vmatpush3.bf16.msra.mxu0 %v287_v1  ;;  %270 = vmatpush3.bf16.msra.mxu1 %v289_v3  ;;  %v290_v4 = vld [vmem:[%s376_s3] sm:$0xff]  }
   0x4   :  { %277 = vmatprep.subr.bf16.mxu0 %v297_v0  ;;  %271 = vmatprep.subr.bf16.mxu1 %v297_v0  ;;  %v243_v5 = vld [vmem:[%s377_s2] ss:$0 sm:$0xff] }
   0x5   :  { %v292_v16 = vld [vmem:[%s378_s5] sm:$0xff]  }
   0x6   :  { %266 = vmatmul.mubr.msk.bf16.vlgmr.msra.gmra.mxu0 %vm49_vm1, %v288_v2  ;;  %v247_v17 = vld [vmem:[%s379_s4] ss:$0 sm:$0xff] }
   0x7   :  { %281 = vmatprep.mubr.msk.bf16.mxu0 %vm298_vm0, %v297_v0  ;;  %272 = vmatpush3.bf16.msra.mxu1 %v290_v4  ;;  %v251_v27 = vld [vmem:[%s380_s6] ss:$0 sm:$0xff] }
   0x8   :  { %278 = vmatpush3.bf16.msra.mxu0 %v291_v15 }
   0x9   :  { %279 = vmatprep.subr.bf16.mxu0 %v297_v0 }
   0xc   :  { %280 = vmatpush3.bf16.msra.mxu0 %v292_v16 }
  0xc6   :  { %v87_v6 = vpop.f32.mrf.mxu0 }
  0xc7   :  { %v88_v8 = vadd.f32 %v243_v5, %v87_v6 }
  0xc8   :  { %v267_v7 = vpop.f32.mrf.mxu0 }
  0xc9   :  { %v94_v12 = vmax.f32 %v88_v8, 0.0 }
  0xca   :  { %v90_v9 = vpop.f32.mrf.mxu0 }
  0xcb   :  { %v91_v10 = vadd.f32 %v243_v5, %v90_v9 }
  0xcc   :  { %v268_v11 = vpop.f32.mrf.mxu0 }
  0xcd   :  { %v95_v13 = vmax.f32 %v91_v10, 0.0 }
  0xcf   :  { %v96_v14 = vpack.c.bf16 %v95_v13, %v94_v12 }
  0xd1   :  { %274 = vmatmul.mubr.msk.bf16.vlgmr.msra.gmra.mxu1 %vm120_vm2, %v96_v14 }
 0x191   :  { %v158_v18 = vpop.f32.mrf.mxu1 }
 0x192   :  { %v159_v20 = vadd.f32 %v247_v17, %v158_v18 }
 0x193   :  { %v275_v19 = vpop.f32.mrf.mxu1 }
 0x194   :  { %v165_v24 = vmax.f32 %v159_v20, 0.0 }
 0x195   :  { %v161_v21 = vpop.f32.mrf.mxu1 }
 0x196   :  { %v162_v22 = vadd.f32 %v247_v17, %v161_v21 }
 0x197   :  { %v276_v23 = vpop.f32.mrf.mxu1 }
 0x198   :  { %v166_v25 = vmax.f32 %v162_v22, 0.0 }
 0x19a   :  { %v167_v26 = vpack.c.bf16 %v166_v25, %v165_v24 }
 0x19c   :  { %282 = vmatmul.mubr.msk.bf16.vlgmr.msra.gmra.mxu0 %vm120_vm2, %v167_v26 }
 0x25c   :  { %v228_v28 = vpop.f32.mrf.mxu0 }
 0x25d   :  { %v229_v29 = vadd.f32 %v251_v27, %v228_v28 }
 0x25e   :  { %v283_v30 = vpop.f32.mrf.mxu0 }
 0x25f   :  { %293 = vtanh.f32 %v229_v29 }
 0x260   :  { %v231_v31 = vpop.f32.mrf.mxu0 }
 0x261   :  { %v232_v32 = vadd.f32 %v251_v27, %v231_v31 }
 0x262   :  { %v284_v33 = vpop.f32.mrf.mxu0 }
 0x263   :  { %295 = vtanh.f32 %v232_v32 }
 0x26c   :  { %v294_v34 = vpop.eup %293 }
 0x26d   :  { %237 = vst [vmem:[%s381_s7] sm:$0xff] %v294_v34 }
 0x270   :  { %v296_v35 = vpop.eup %295 }
 0x271   :  { %238 = vst [vmem:[%s381_s7 + $0x8] sm:$0xff] %v296_v35 }

</bundles_post_ra>
